<compile_context>
chip_gen: v5e
topology: v5e:2x2
jax: 0.10.0
libtpu: 0.0.40
codegen_flags: <defaults>
</compile_context>

<pallas_src>
import jax
import jax.numpy as jnp
from jax.experimental import pallas as pl
from jax.experimental.pallas import tpu as pltpu


_VMEM_LIMIT_BYTES = 40 * 1024 * 1024   # scoped VMEM limit handed to Mosaic
_VMEM_TILE_BUDGET = 32 * 1024 * 1024   # budget the derived tiles must fit in


def _round_up(x: int, m: int) -> int:
    return ((x + m - 1) // m) * m


def _head_kernel(x_ref, w_ref, b_ref, o_ref, acc_ref):
    # x_ref:   (TN, C, THW) input block, NCHW-native (spatial on lanes).
    # w_ref:   (C, Kp) f32, pre-scaled by 1/HW; resident across the grid.
    # b_ref:   (1, Kp) f32; resident across the grid.
    # o_ref:   (TN, Kp) f32 lane-dense output tile (same block across s).
    # acc_ref: (TN, C) f32 scratch: running spatial sum.
    s = pl.program_id(1)

    @pl.when(s == 0)
    def _():
        acc_ref[...] = jnp.zeros_like(acc_ref)

    # Partial spatial sum: cross-lane (XLU) reduce over THW, f32 accumulate.
    acc_ref[...] += jnp.sum(x_ref[...], axis=-1).astype(jnp.float32)

    @pl.when(s == pl.num_programs(1) - 1)
    def _():
        # acc holds sum over H*W; W is pre-scaled by 1/HW, so this is the
        # average pool followed by the linear projection (MXU, f32 acc).
        o_ref[...] = (
            jnp.dot(acc_ref[...], w_ref[...],
                    preferred_element_type=jnp.float32)
            + b_ref[...]
        ).astype(o_ref.dtype)


def _choose_tiles(N, C, HW, Kp, budget_bytes):
    """Pick (TN, THW) so double-buffered blocks fit the VMEM budget."""
    itemsize = 4
    # weight + bias (conservatively counted as double-buffered).
    fixed = 2 * C * Kp * itemsize + 2 * Kp * itemsize

    def max_rows(thw):
        per_row = 2 * C * thw * itemsize + 2 * Kp * itemsize + C * itemsize
        return (budget_bytes - fixed) // per_row

    # Spatial tile candidates: full HW, or exact divisors of HW that are
    # multiples of 128 (lane-aligned and exact, so the reduction never sees
    # out-of-bounds garbage).
    cands = [HW] + [t for t in range(128, HW, 128) if HW % t == 0]
    cands.sort(reverse=True)

    target_rows = min(N, 8)
    thw = cands[-1]
    for c in cands:
        if max_rows(c) >= target_rows:
            thw = c
            break

    tn = int(min(N, max(1, max_rows(thw)), 128))
    if tn >= 8:
        tn = (tn // 8) * 8
    # Keep >= 2 batch steps when the batch is big enough (v7x megacore split
    # + DMA/compute overlap); a single whole-batch step leaves a core idle.
    if tn == N and N >= 16:
        tn = _round_up((N + 1) // 2, 8)
    return tn, thw


def classy_head_forward(x_nchw, weight, bias):
    """ClassyHead forward (canonical avgpool + linear realization).

    Args:
      x_nchw: (N, C, H, W) features, consumed in native layout/dtype.
      weight: (C, K) projection weight (K = num_classes).
      bias:   (K,) bias.

    Returns:
      (N, K) float32 logits.
    """
    N, C, H, W = x_nchw.shape
    K = weight.shape[1]
    HW = H * W

    # Native NCHW layout, no transpose / cast / pad of x: spatial dims fold
    # onto the lane axis, channels sit on sublanes.
    x = x_nchw.reshape(N, C, HW)

    # Fold the average-pool 1/HW scale into the (tiny) weight once, and pad
    # num_classes up to a multiple of 128 for lane-dense output stores.
    Kp = _round_up(K, 128)
    w = weight.astype(jnp.float32) * (1.0 / HW)
    b = bias.astype(jnp.float32).reshape(1, K)
    if Kp != K:
        w = jnp.pad(w, ((0, 0), (0, Kp - K)))
        b = jnp.pad(b, ((0, 0), (0, Kp - K)))

    TN, THW = _choose_tiles(N, C, HW, Kp, _VMEM_TILE_BUDGET)
    grid = (pl.cdiv(N, TN), HW // THW)

    cost = pl.CostEstimate(
        flops=2 * N * C * Kp + N * C * HW,
        transcendentals=0,
        bytes_accessed=(x.size * x.dtype.itemsize + w.size * 4 + b.size * 4
                        + N * Kp * 4),
    )

    out = pl.pallas_call(
        _head_kernel,
        out_shape=jax.ShapeDtypeStruct((N, Kp), jnp.float32),
        grid_spec=pltpu.PrefetchScalarGridSpec(
            num_scalar_prefetch=0,
            grid=grid,
            in_specs=[
                # x: one (batch, spatial) tile per step (pipelined DMA).
                pl.BlockSpec((TN, C, THW), lambda i, s: (i, 0, s)),
                # weight / bias: same block every step -> stay resident.
                # TODO(synk): pipeline_mode=pl.Buffered(1) would reclaim
                #             their second buffer; kept default for
                #             portability and already counted in the budget.
                pl.BlockSpec((C, Kp), lambda i, s: (0, 0)),
                pl.BlockSpec((1, Kp), lambda i, s: (0, 0)),
            ],
            out_specs=pl.BlockSpec((TN, Kp), lambda i, s: (i, 0)),
            scratch_shapes=[pltpu.VMEM((TN, C), jnp.float32)],
        ),
        compiler_params=pltpu.CompilerParams(
            dimension_semantics=("parallel", "arbitrary"),
            vmem_limit_bytes=_VMEM_LIMIT_BYTES,
        ),
        cost_estimate=cost,
    )(x, w, b)

    return out[:, :K] if Kp != K else out


if __name__ == "__main__":
    # Small shapes consistent with a conv-feature head: N=2, C=4, H=W=16.
    N, C, H, W = 2, 4, 16, 16
    num_classes = 10

    key = jax.random.PRNGKey(0)
    kx, kw, kb = jax.random.split(key, 3)

    x = jax.random.normal(kx, (N, C, H, W), dtype=jnp.float32)

    # Deterministic nn.Linear-style init: U(-1/sqrt(C), 1/sqrt(C)).
    bound = 1.0 / jnp.sqrt(jnp.float32(C))
    weight = jax.random.uniform(kw, (C, num_classes), jnp.float32, -bound, bound)
    bias = jax.random.uniform(kb, (num_classes,), jnp.float32, -bound, bound)

    out = classy_head_forward(x, weight, bias)
    jax.block_until_ready(out)

    # Reference check in plain JAX (f32).
    ref = x.reshape(N, C, H * W).mean(-1) @ weight + bias
    assert out.shape == (N, num_classes)
    assert jnp.allclose(out, ref, atol=1e-2, rtol=1e-2), (
        jnp.max(jnp.abs(out - ref)))

    print("KERNEL_OK")
</pallas_src>

<mosaic_0001>
module attributes {stable_mosaic.version = 11 : i64} {
  func.func @_head_kernel(%arg0: i32, %arg1: i32, %arg2: memref<2x4x256xf32, #tpu.memory_space<vmem>>, %arg3: memref<4x128xf32, #tpu.memory_space<vmem>>, %arg4: memref<1x128xf32, #tpu.memory_space<vmem>>, %arg5: memref<2x128xf32, #tpu.memory_space<vmem>>, %arg6: memref<2x4xf32, #tpu.memory_space<vmem>>) attributes {dimension_semantics = [#tpu.dimension_semantics<parallel>, #tpu.dimension_semantics<arbitrary>], iteration_bounds = array<i64: 1, 1>, scalar_prefetch = 0 : i64, scratch_operands = 1 : i64, tpu.core_type = #tpu.core_type<tc>, window_params = [{transform_indices = @transform_0, window_bounds = array<i64: 2, 4, 256>}, {pipeline_mode = #tpu.pipeline_mode<synchronous>, transform_indices = @transform_1, window_bounds = array<i64: 4, 128>}, {pipeline_mode = #tpu.pipeline_mode<synchronous>, transform_indices = @transform_2, window_bounds = array<i64: 1, 128>}, {transform_indices = @transform_3, window_bounds = array<i64: 2, 128>}]} {
    %c0_i32 = arith.constant 0 : i32
    %0 = arith.cmpi eq, %arg1, %c0_i32 : i32
    %1 = arith.extui %0 : i1 to i32
    %c0_i32_0 = arith.constant 0 : i32
    %2 = arith.cmpi ne, %1, %c0_i32_0 : i32
    scf.if %2 {
      %cst_9 = arith.constant 0.000000e+00 : f32
      %11 = vector.broadcast %cst_9 : f32 to vector<2x4xf32>
      %c0_10 = arith.constant 0 : index
      %c0_11 = arith.constant 0 : index
      %12 = vector.load %arg6[%c0_10, %c0_11] : memref<2x4xf32, #tpu.memory_space<vmem>>, vector<2x4xf32>
      tpu.vector_store %arg6[%c0_10, %c0_11], %11 {strides = array<i32>} : memref<2x4xf32, #tpu.memory_space<vmem>>, vector<2x4xf32>,
    } else {
    }
    %c0 = arith.constant 0 : index
    %c0_1 = arith.constant 0 : index
    %3 = vector.load %arg6[%c0, %c0_1] : memref<2x4xf32, #tpu.memory_space<vmem>>, vector<2x4xf32>
    %c0_2 = arith.constant 0 : index
    %c0_3 = arith.constant 0 : index
    %c0_4 = arith.constant 0 : index
    %4 = vector.load %arg2[%c0_2, %c0_3, %c0_4] : memref<2x4x256xf32, #tpu.memory_space<vmem>>, vector<2x4x256xf32>
    %cst = arith.constant dense<0.000000e+00> : vector<2x4xf32>
    %5 = vector.multi_reduction <add>, %4, %cst [2] : vector<2x4x256xf32> to vector<2x4xf32>
    %6 = arith.addf %3, %5 : vector<2x4xf32>
    %c0_5 = arith.constant 0 : index
    %c0_6 = arith.constant 0 : index
    %7 = vector.load %arg6[%c0_5, %c0_6] : memref<2x4xf32, #tpu.memory_space<vmem>>, vector<2x4xf32>
    tpu.vector_store %arg6[%c0_5, %c0_6], %6 {strides = array<i32>} : memref<2x4xf32, #tpu.memory_space<vmem>>, vector<2x4xf32>,
    %c0_i32_7 = arith.constant 0 : i32
    %8 = arith.cmpi eq, %arg1, %c0_i32_7 : i32
    %9 = arith.extui %8 : i1 to i32
    %c0_i32_8 = arith.constant 0 : i32
    %10 = arith.cmpi ne, %9, %c0_i32_8 : i32
    scf.if %10 {
      %c0_9 = arith.constant 0 : index
      %c0_10 = arith.constant 0 : index
      %11 = vector.load %arg6[%c0_9, %c0_10] : memref<2x4xf32, #tpu.memory_space<vmem>>, vector<2x4xf32>
      %c0_11 = arith.constant 0 : index
      %c0_12 = arith.constant 0 : index
      %12 = vector.load %arg3[%c0_11, %c0_12] : memref<4x128xf32, #tpu.memory_space<vmem>>, vector<4x128xf32>
      %cst_13 = arith.constant dense<0.000000e+00> : vector<2x128xf32>
      %13 = tpu.matmul %11, %12, %cst_13 {dimension_numbers = #tpu.dot_dimension_numbers<[1], [0], [0], [1], [0, 0, 1, 1], [], []>} : vector<2x4xf32>, vector<4x128xf32>, vector<2x128xf32> -> vector<2x128xf32>
      %c0_14 = arith.constant 0 : index
      %c0_15 = arith.constant 0 : index
      %14 = vector.load %arg4[%c0_14, %c0_15] : memref<1x128xf32, #tpu.memory_space<vmem>>, vector<1x128xf32>
      %15 = vector.broadcast %14 : vector<1x128xf32> to vector<2x128xf32>
      %16 = arith.addf %13, %15 : vector<2x128xf32>
      %c0_16 = arith.constant 0 : index
      %c0_17 = arith.constant 0 : index
      %17 = vector.load %arg5[%c0_16, %c0_17] : memref<2x128xf32, #tpu.memory_space<vmem>>, vector<2x128xf32>
      tpu.vector_store %arg5[%c0_16, %c0_17], %16 {strides = array<i32>} : memref<2x128xf32, #tpu.memory_space<vmem>>, vector<2x128xf32>,
    } else {
    }
    return
  }
  func.func @transform_0(%arg0: i32, %arg1: i32) -> (i32, i32, i32) {
    %c0_i32 = arith.constant 0 : i32
    %c0_i32_0 = arith.constant 0 : i32
    return %arg0, %c0_i32, %arg1 : i32, i32, i32
  }
  func.func @transform_1(%arg0: i32, %arg1: i32) -> (i32, i32) {
    %c0_i32 = arith.constant 0 : i32
    %c0_i32_0 = arith.constant 0 : i32
    %c0_i32_1 = arith.constant 0 : i32
    return %c0_i32, %c0_i32_0 : i32, i32
  }
  func.func @transform_2(%arg0: i32, %arg1: i32) -> (i32, i32) {
    %c0_i32 = arith.constant 0 : i32
    %c0_i32_0 = arith.constant 0 : i32
    %c0_i32_1 = arith.constant 0 : i32
    return %c0_i32, %c0_i32_0 : i32, i32
  }
  func.func @transform_3(%arg0: i32, %arg1: i32) -> (i32, i32) {
    %c0_i32 = arith.constant 0 : i32
    %c0_i32_0 = arith.constant 0 : i32
    return %arg0, %c0_i32 : i32, i32
  }
}

</mosaic_0001>

<bundles_post_ra>
// kernel: tpu_custom_call.1
= control target key start
LH: loop header
LB: loop body
LE: loop exit
PB: predicated region body
PF: predicated region fallthrough
CT: control target
= control target key end

     0   :  { %8 = vsyncpa [#allocation4], 0  ;;  %s275_s0 = inlined_call_operand.hbm [shape: f32[2,4,256], index: 0, kind: input, shape index: {}]   ;;  %s276_s1 = inlined_call_operand.hbm [shape: f32[4,128], index: 1, kind: input, shape index: {}]   ;;  %s277_s2 = inlined_call_operand.vmem [shape: f32[1,128], index: 2, kind: input, shape index: {}]   ;;  %s278_s3 = inlined_call_operand.hbm [shape: f32[2,128], index: 3, kind: output, shape index: {}]  }
   0x1   :  { %9 = vsyncpa [#allocation7], 0 }
   0x2   :  { %10 = vsyncpa [#allocation5], 0  ;;  %s15_s14 = sshll.u32 %s275_s0, 4  ;;  %s232_s15 = smov [#allocation3]   ;;  %s16_s14 = int_to_ptr.hbm [resolvable:$true] %s15_s14 }
   0x3   :  { %s17_s16 = sshll.u32 %s232_s15, 4  ;;  %s29_s19 = sshll.u32 %s276_s1, 4  ;;  %s18_s16 = int_to_ptr.vmem [resolvable:$true] %s17_s16  ;;  %s30_s19 = int_to_ptr.hbm [resolvable:$true] %s29_s19 }
   0x4   :  { %s233_s20 = smov 128   ;;  %s234_s21 = smov 8  }
   0x5   :  { %23 = dma.hbm_to_vmem [thread:$0]  %s16_s14, 256, %s18_s16, [#allocation4], %s233_s20, %s233_s20, %s234_s21  }
   0x6   :  { %s235_s22 = smov [#allocation6]  }
   0x7   :  { %s31_s23 = sshll.u32 %s235_s22, 4  ;;  %s32_s23 = int_to_ptr.vmem [resolvable:$true] %s31_s23 }
   0x8   :  { %34 = dma.hbm_to_vmem [thread:$0]  %s30_s19, 64, %s32_s23, [#allocation7]  }
   0x9   :  { %226 = dma.done.wait [#allocation4], 256  }
   0xa   :  { %227 = vsyncadd [#allocation4], 4294967040 }
   0xb   :  { %228 = dma.done.wait [#allocation7], 64  }
   0xc   :  { %229 = vsyncadd [#allocation7], 4294967232  ;;  %v52_v0 = vld [vmem:[#allocation3] sm:$0xff]  ;;  %v53_v1 = vld [vmem:[#allocation3 + $0x8] sm:$0xff]  ;;  %vm67_vm0 = vcmask 1043456   ;;  %vm49_vm1 = vcmask 25600   ;;  %v80_v15 = vlaneseq }
   0xd   :  { %56 = vst [vmem:[#allocation1] ss:$2 sm:$0xff] %v52_v0  ;;  %v236_v12 = vmov 0.0   ;;  %v94_v13 = vld [vmem:[#allocation6] sm:$0xf]  ;;  %vm84_vm2 = vcmask 1041409  }
   0xe   :  { %60 = vst [vmem:[#allocation1 + $0x10] ss:$2 sm:$0xff] %v53_v1  ;;  %145 = vmatpush.msk.msra.mxu0 %vm67_vm0, %v94_v13  ;;  %v81_v16 = vand.u32 127, %v80_v15  ;;  %vm99_vm3 = vcmask 31744   ;;  %v153_v24 = vld [vmem:[%s277_s2] ss:$0 sm:$0xff] }
   0xf   :  { %50 = vst.msk [vmem:[#allocation2] sm:$0x3] %vm49_vm1, %v236_v12  ;;  %s237_s24 = smov [#allocation8]   ;;  %s134_s28 = sshll.u32 %s278_s3, 4  ;;  %s135_s28 = int_to_ptr.hbm [resolvable:$true] %s134_s28 }
  0x10   :  { %s132_s25 = sshll.u32 %s237_s24, 4  ;;  %s133_s25 = int_to_ptr.vmem [resolvable:$true] %s132_s25 }
  0x14   :  { %v57_v2 = vld.sshfl [vmem:[#allocation1] sm:$0xff pattern:$0x75316420]  ;;  %v58_v3 = vld.sshfl [vmem:[#allocation1 + $0x8] sm:$0xff pattern:$0x75316420] }
  0x15   :  { %v68_v4 = vsel %vm67_vm0, %v57_v2, 0.0  ;;  %v69_v5 = vsel %vm67_vm0, %v58_v3, 0.0  ;;  %v61_v7 = vld.sshfl [vmem:[#allocation1 + $0x10] sm:$0xff pattern:$0x75316420] }
  0x16   :  { %v70_v6 = vadd.f32 %v69_v5, %v68_v4  ;;  %v62_v8 = vld.sshfl [vmem:[#allocation1 + $0x18] sm:$0xff pattern:$0x75316420]  ;;  %v73_v9 = vsel %vm67_vm0, %v61_v7, 0.0  ;;  %v51_v19 = vld [vmem:[#allocation2] sm:$0x3] }
  0x17   :  { %v74_v10 = vsel %vm67_vm0, %v62_v8, 0.0 }
  0x18   :  { %71 = vadd.xlane.f32.xlu0 %v70_v6  ;;  %v75_v11 = vadd.f32 %v74_v10, %v73_v9 }
  0x20   :  { %76 = vadd.xlane.f32.xlu0 %v75_v11 }
  0x8b   :  { %v72_v14 = vpop.xlane.xlu0 %71 }
  0x8c   :  { %v82_v18 = vperm.slane %v72_v14, %v81_v16 }
  0x93   :  { %v77_v17 = vpop.xlane.xlu0 %76 }
  0x94   :  { %v83_v20 = vperm.slane %v77_v17, %v81_v16 }
  0x96   :  { %v85_v21 = vsel %vm84_vm2, %v83_v20, %v82_v18 }
  0x97   :  { %v87_v22 = vadd.f32 %v85_v21, %v51_v19 }
  0x99   :  { %89 = vst.msk [vmem:[#allocation2] sm:$0x3] %vm49_vm1, %v87_v22 }
  0xa0   :  { %v93_v23 = vld [vmem:[#allocation2] sm:$0x3] }
  0xa1   :  { %146 = vmatmul.msk.f32.vlgmr.msra.gmra.mxu0 %vm99_vm3, %v93_v23 }
 0x11e   :  { %v123_v25 = vpop.f32.mrf.mxu0 }
 0x11f   :  { %v124_v26 = vadd.f32 %v153_v24, %v123_v25 }
 0x121   :  { %126 = vst [vmem:[#allocation8] sm:$0x3] %v124_v26 }
 0x122   :  { %137 = dma.vmem_to_hbm [thread:$0]  %s133_s25, 32, %s135_s28, [#allocation5]  }
 0x123   :  { %230 = dma.done.wait [#allocation5], 32  }
 0x124   :  { %231 = vsyncadd [#allocation5], 4294967264 }
 0x125   :  { %142 = vsyncpa [#allocation4], 1 }
 0x126   :  { %143 = vsyncpa [#allocation7], 1 }
 0x127   :  { %144 = vsyncpa [#allocation5], 1 }

</bundles_post_ra>
